<compile_context>
chip_gen: v5e
topology: v5e:2x2
jax: 0.10.0
libtpu: 0.0.40
codegen_flags: <defaults>
</compile_context>

<pallas_src>
import functools
import math
from collections import deque

import numpy as np
import jax
import jax.numpy as jnp
from jax import lax
from jax.experimental import pallas as pl
from jax.experimental.pallas import tpu as pltpu

HIDDEN = 128        # hidden_size hardcoded in Pool.forward
NUM_HEADS = 2       # num_heads hardcoded in Pool.forward
HEAD = HIDDEN // NUM_HEADS


def _round_up(x, m):
    return ((x + m - 1) // m) * m


def _sigmoid(x):
    return 1.0 / (1.0 + jnp.exp(-x))


# ----------------------------- Pallas kernels -------------------------------

def _attn_score_kernel(h_ref, wqk_ref, bqk_ref, wvdT_ref, bvdT_ref, bd_ref,
                       out_ref, q_sc, k_sc, vw_sc, *, n_real):
    """One query tile of 2-head attention; writes raw att scores as (1, TQ)."""
    tq = out_ref.shape[1]
    n_pad = h_ref.shape[0]
    qi = pl.program_id(0)

    # Fused bf16 Q|K projection + folded V*dense head, computed once (step 0)
    # into VMEM scratch that persists across the (sequential) grid.
    @pl.when(qi == 0)
    def _():
        hf = h_ref[...]                                            # (Np, D) bf16
        qk = jnp.dot(hf, wqk_ref[...],
                     preferred_element_type=jnp.float32) + bqk_ref[...]
        q_sc[...] = qk[:, :HIDDEN].astype(jnp.bfloat16)            # (Np, 128)
        k_sc[...] = qk[:, HIDDEN:].astype(jnp.bfloat16)            # (Np, 128)
        # vw[h, j] = (h_j @ Wv + bv) . wd_head_h   (dense->1 folded into V)
        vw_sc[...] = lax.dot_general(
            wvdT_ref[...], hf, (((1,), (1,)), ((), ())),
            preferred_element_type=jnp.float32) + bvdT_ref[...]    # (2, Np)

    qstart = pl.multiple_of(qi * tq, tq)
    q_tile = q_sc[pl.ds(qstart, tq), :]                            # (TQ, 128) bf16

    inv_sqrt = 1.0 / math.sqrt(HEAD)
    key_mask = None
    if n_real < n_pad:
        key_mask = lax.broadcasted_iota(jnp.int32, (n_pad, 1), 0) < n_real

    # TODO(synk): attn_dropout / out_dropout are identity (eval mode).
    att = jnp.zeros((1, tq), jnp.float32)
    for hd in range(NUM_HEADS):
        lo, hi = hd * HEAD, (hd + 1) * HEAD
        kh = k_sc[:, lo:hi]                                        # (Np, 64) bf16
        qh = q_tile[:, lo:hi]                                      # (TQ, 64) bf16
        # s_T[j, i] = <k_j, q_i> / sqrt(head): keys on sublanes, queries on lanes
        s_t = lax.dot_general(kh, qh, (((1,), (1,)), ((), ())),
                              preferred_element_type=jnp.float32) * inv_sqrt
        if key_mask is not None:
            s_t = jnp.where(key_mask, s_t, -1e30)
        m = jnp.max(s_t, axis=0, keepdims=True)                    # (1, TQ)
        e_t = jnp.exp(s_t - m)                                     # (Np, TQ)
        rs = jnp.sum(e_t, axis=0, keepdims=True)                   # (1, TQ)
        # folded PV path: (1, Np) x (Np, TQ) matvec instead of (TQ,Np)x(Np,64)
        unnorm = jnp.dot(vw_sc[hd:hd + 1, :], e_t,
                         preferred_element_type=jnp.float32)       # (1, TQ)
        att = att + unnorm * pl.reciprocal(rs, approx=True)        # deferred softmax norm

    out_ref[...] = att + bd_ref[...]                               # + dense bias


def _score_fuse_kernel(att_ref, s2_ref, va_ref, vb_ref, out_ref, *, n_real):
    """Lane-dense (1, N) view-attention score fusion."""
    att = att_ref[...]                                             # (1, Np)
    score1 = _sigmoid(att)
    score2 = _sigmoid(s2_ref[...])
    n_pad = att.shape[1]
    if n_real < n_pad:
        mask = lax.broadcasted_iota(jnp.int32, (1, n_pad), 1) < n_real
        a1 = jnp.where(mask, jnp.abs(score1), 0.0)
        a2 = jnp.where(mask, jnp.abs(score2), 0.0)
    else:
        a1, a2 = jnp.abs(score1), jnp.abs(score2)

    # score_cat / max(|score_cat|, dim=0)  (per-view normalization)
    c0 = score1 / jnp.max(a1, axis=1, keepdims=True)
    c1 = score2 / jnp.max(a2, axis=1, keepdims=True)

    # sigmoid(score_cat @ view_att + view_bias); view_att is (2, 2) in SMEM
    w0 = _sigmoid(c0 * va_ref[0, 0] + c1 * va_ref[1, 0] + vb_ref[0])
    w1 = _sigmoid(c0 * va_ref[0, 1] + c1 * va_ref[1, 1] + vb_ref[1])
    # softmax over the 2 views, then weighted sum + sigmoid
    m = jnp.maximum(w0, w1)
    e0 = jnp.exp(w0 - m)
    e1 = jnp.exp(w1 - m)
    out_ref[...] = _sigmoid((c0 * e0 + c1 * e1) / (e0 + e1))


def _graph_power_kernel(a_ref, b_ref, o_ref, acc_ref):
    """Tiled bool(g) @ bool(g) -> bool, bf16 MXU inputs, f32 accumulation."""
    @pl.when(pl.program_id(2) == 0)
    def _():
        acc_ref[...] = jnp.zeros_like(acc_ref)

    acc_ref[...] += jnp.dot(a_ref[...], b_ref[...],
                            preferred_element_type=jnp.float32)

    @pl.when(pl.program_id(2) == pl.num_programs(2) - 1)
    def _():
        o_ref[...] = (acc_ref[...] > 0.5).astype(jnp.float32)


# --------------------- host-side centralities (numpy) -----------------------
# TODO(synk): networkx betweenness/closeness/degree centralities have no Pallas
# equivalent; computed on host with numpy using the same (unweighted) math.

def _neighbors(adj):
    return [np.nonzero(adj[i])[0].tolist() for i in range(adj.shape[0])]


def _degree_centrality(adj):
    n = adj.shape[0]
    a = (adj != 0)
    deg = a.sum(1) + np.diag(a)   # self-loop counts twice (networkx semantics)
    return deg.astype(np.float64) / (n - 1)


def _closeness_centrality(adj):
    n = adj.shape[0]
    nbrs = _neighbors(adj)
    cc = np.zeros(n)
    for u in range(n):
        dist = -np.ones(n, dtype=np.int64)
        dist[u] = 0
        q = deque([u])
        while q:
            v = q.popleft()
            for w in nbrs[v]:
                if dist[w] < 0:
                    dist[w] = dist[v] + 1
                    q.append(w)
        reach = dist >= 0
        tot = dist[reach].sum()
        nr = int(reach.sum())
        if tot > 0 and n > 1:
            cc[u] = ((nr - 1) / tot) * ((nr - 1) / (n - 1))
    return cc


def _betweenness_centrality(adj):
    n = adj.shape[0]
    nbrs = _neighbors(adj)
    cb = np.zeros(n)
    for s in range(n):
        stack = []
        preds = [[] for _ in range(n)]
        sigma = np.zeros(n)
        sigma[s] = 1.0
        dist = -np.ones(n, dtype=np.int64)
        dist[s] = 0
        q = deque([s])
        while q:
            v = q.popleft()
            stack.append(v)
            for w in nbrs[v]:
                if dist[w] < 0:
                    dist[w] = dist[v] + 1
                    q.append(w)
                if dist[w] == dist[v] + 1:
                    sigma[w] += sigma[v]
                    preds[w].append(v)
        delta = np.zeros(n)
        while stack:
            w = stack.pop()
            for v in preds[w]:
                delta[v] += sigma[v] / sigma[w] * (1.0 + delta[w])
            if w != s:
                cb[w] += delta[w]
    if n > 2:
        cb *= 1.0 / ((n - 1) * (n - 2))
    return cb


# ----------------------------- params ---------------------------------------

def init_params(key, in_dim):
    ks = jax.random.split(key, 9)

    def lin(kw, kb, fin, fout):
        bound = 1.0 / math.sqrt(fin)
        W = jax.random.uniform(kw, (fin, fout), jnp.float32, -bound, bound)
        b = jax.random.uniform(kb, (1, fout), jnp.float32, -bound, bound)
        return W, b

    wq, bq = lin(ks[0], ks[1], in_dim, HIDDEN)
    wk, bk = lin(ks[2], ks[3], in_dim, HIDDEN)
    wv, bv = lin(ks[4], ks[5], in_dim, HIDDEN)
    wd, bd = lin(ks[6], ks[7], HIDDEN, 1)          # dense: hidden -> 1
    xav = math.sqrt(6.0 / (2 + 2))                 # xavier_uniform on (2, 2)
    va = jax.random.uniform(ks[8], (2, 2), jnp.float32, -xav, xav)
    vb = jnp.zeros((2,), jnp.float32)              # view_bias zeros

    # --- kernel-ready folding -------------------------------------------------
    # fused Q|K projection, bf16 into the MXU
    wqk = jnp.concatenate([wq, wk], axis=1).astype(jnp.bfloat16)   # (D, 256)
    bqk = jnp.concatenate([bq, bk], axis=1)                        # (1, 256) f32
    # block-diagonal dense head (per-head 64-slice of wd), folded into Wv:
    wd_bd = jnp.zeros((HIDDEN, NUM_HEADS), jnp.float32)
    for hd in range(NUM_HEADS):
        wd_bd = wd_bd.at[hd * HEAD:(hd + 1) * HEAD, hd].set(
            wd[hd * HEAD:(hd + 1) * HEAD, 0])
    wvdT = (wv @ wd_bd).T.astype(jnp.bfloat16)                     # (2, D)
    bvdT = (bv @ wd_bd).reshape(NUM_HEADS, 1)                      # (2, 1) f32
    return dict(wqk=wqk, bqk=bqk, wvdT=wvdT, bvdT=bvdT,
                bd=bd, va=va, vb=vb)                               # bd is (1, 1)


# ----------------------------- wrapper ---------------------------------------

def pool_forward(g, h, params, k):
    N, D = h.shape

    # ---------------- device work launched first (async) --------------------
    TQ = 128                                        # query tile (v7x-safe footprint)
    Np = _round_up(max(N, TQ), TQ)
    h_pad = jnp.pad(h.astype(jnp.bfloat16), ((0, Np - N), (0, 0)))

    att_row = pl.pallas_call(
        functools.partial(_attn_score_kernel, n_real=N),
        out_shape=jax.ShapeDtypeStruct((1, Np), jnp.float32),
        grid=(Np // TQ,),
        in_specs=[
            pl.BlockSpec((Np, D), lambda qi: (0, 0)),              # h (all nodes)
            pl.BlockSpec((D, 2 * HIDDEN), lambda qi: (0, 0)),      # fused Wq|Wk
            pl.BlockSpec((1, 2 * HIDDEN), lambda qi: (0, 0)),      # fused bq|bk
            pl.BlockSpec((NUM_HEADS, D), lambda qi: (0, 0)),       # (Wv @ wd)^T
            pl.BlockSpec((NUM_HEADS, 1), lambda qi: (0, 0)),       # (bv @ wd)^T
            pl.BlockSpec((1, 1), lambda qi: (0, 0)),               # dense bias
        ],
        out_specs=pl.BlockSpec((1, TQ), lambda qi: (0, qi)),       # lane-dense att
        scratch_shapes=[
            pltpu.VMEM((Np, HIDDEN), jnp.bfloat16),                # Q, all nodes
            pltpu.VMEM((Np, HIDDEN), jnp.bfloat16),                # K, all nodes
            pltpu.VMEM((NUM_HEADS, Np), jnp.float32),              # V @ dense head
        ],
        compiler_params=pltpu.CompilerParams(
            # "arbitrary": scratch is initialized at grid step 0 and reused.
            dimension_semantics=("arbitrary",),
            vmem_limit_bytes=48 * 1024 * 1024),
    )(h_pad, params["wqk"], params["bqk"], params["wvdT"], params["bvdT"],
      params["bd"])

    # graph power: tiled (i, j, k) bf16 matmul (block sizes fit v7x's 64 MiB VMEM)
    TBg = 512 if N > 2048 else (256 if N > 512 else 128)
    Ng = _round_up(max(N, TBg), TBg)
    gb = jnp.pad((g != 0).astype(jnp.bfloat16), ((0, Ng - N), (0, Ng - N)))
    nbg = Ng // TBg

    un_g2_pad = pl.pallas_call(
        _graph_power_kernel,
        out_shape=jax.ShapeDtypeStruct((Ng, Ng), jnp.float32),
        grid=(nbg, nbg, nbg),
        in_specs=[pl.BlockSpec((TBg, TBg), lambda i, j, kk: (i, kk)),
                  pl.BlockSpec((TBg, TBg), lambda i, j, kk: (kk, j))],
        out_specs=pl.BlockSpec((TBg, TBg), lambda i, j, kk: (i, j)),
        scratch_shapes=[pltpu.VMEM((TBg, TBg), jnp.float32)],
        compiler_params=pltpu.CompilerParams(
            dimension_semantics=("parallel", "parallel", "arbitrary")),
    )(gb, gb)

    # ---------------- host-side centralities overlap device kernels ----------
    adj = np.asarray(jax.device_get(g))
    s2_np = (_betweenness_centrality(adj) + _degree_centrality(adj)
             + _closeness_centrality(adj)).astype(np.float32)
    s2_row = jnp.pad(jnp.asarray(s2_np).reshape(1, N), ((0, 0), (0, Np - N)))

    VMEM = pltpu.MemorySpace.VMEM
    SMEM = pltpu.MemorySpace.SMEM
    scores_row = pl.pallas_call(
        functools.partial(_score_fuse_kernel, n_real=N),
        out_shape=jax.ShapeDtypeStruct((1, Np), jnp.float32),
        in_specs=[pl.BlockSpec(memory_space=VMEM),   # raw attention scores
                  pl.BlockSpec(memory_space=VMEM),   # centrality scores
                  pl.BlockSpec(memory_space=SMEM),   # view_att (2, 2)
                  pl.BlockSpec(memory_space=SMEM)],  # view_bias (2,)
        out_specs=pl.BlockSpec(memory_space=VMEM),
    )(att_row, s2_row, params["va"], params["vb"])

    scores = scores_row[0, :N]
    un_g2 = un_g2_pad[:N, :N]

    # ---- top_k_graph: index-dependent selection done in plain JAX glue ----
    Ksel = max(2, int(k * N))
    values, idx = jax.lax.top_k(scores, Ksel)
    new_h = h[idx, :] * values[:, None]
    un_g = un_g2[idx, :][:, idx]
    degrees = jnp.sum(un_g, axis=1)
    # matches torch broadcasting in norm_g: g / degrees divides *columns*
    g_new = un_g / degrees
    return g_new, new_h, idx


if __name__ == "__main__":
    N, D = 16, 32
    k = 0.5

    key = jax.random.PRNGKey(0)
    k_h, k_g, k_p = jax.random.split(key, 3)

    h = jax.random.normal(k_h, (N, D), jnp.float32)

    # deterministic symmetric 0/1 adjacency, zero diagonal, ring for connectivity
    A = (jax.random.uniform(k_g, (N, N)) > 0.7).astype(jnp.float32)
    A = jnp.maximum(A, A.T)
    ring = jnp.roll(jnp.eye(N, dtype=jnp.float32), 1, axis=1)
    A = jnp.maximum(A, jnp.maximum(ring, ring.T))
    A = A * (1.0 - jnp.eye(N, dtype=jnp.float32))

    params = init_params(k_p, D)

    g_new, new_h, idx = pool_forward(A, h, params, k)
    jax.block_until_ready((g_new, new_h, idx))

    Ksel = max(2, int(k * N))
    assert g_new.shape == (Ksel, Ksel)
    assert new_h.shape == (Ksel, D)
    assert idx.shape == (Ksel,)
    assert bool(jnp.all(jnp.isfinite(new_h)))
    print("KERNEL_OK")
</pallas_src>

<mosaic_0001>
module attributes {stable_mosaic.version = 11 : i64} {
  func.func @_attn_score_kernel(%arg0: i32, %arg1: memref<128x32xbf16, #tpu.memory_space<vmem>>, %arg2: memref<32x256xbf16, #tpu.memory_space<vmem>>, %arg3: memref<1x256xf32, #tpu.memory_space<vmem>>, %arg4: memref<2x32xbf16, #tpu.memory_space<vmem>>, %arg5: memref<2x1xf32, #tpu.memory_space<vmem>>, %arg6: memref<1x1xf32, #tpu.memory_space<vmem>>, %arg7: memref<1x128xf32, #tpu.memory_space<vmem>>, %arg8: memref<128x128xbf16, #tpu.memory_space<vmem>>, %arg9: memref<128x128xbf16, #tpu.memory_space<vmem>>, %arg10: memref<2x128xf32, #tpu.memory_space<vmem>>) attributes {dimension_semantics = [#tpu.dimension_semantics<arbitrary>], iteration_bounds = array<i64: 1>, scalar_prefetch = 0 : i64, scratch_operands = 3 : i64, tpu.core_type = #tpu.core_type<tc>, window_params = [{pipeline_mode = #tpu.pipeline_mode<synchronous>, transform_indices = @transform_0, window_bounds = array<i64: 128, 32>}, {pipeline_mode = #tpu.pipeline_mode<synchronous>, transform_indices = @transform_1, window_bounds = array<i64: 32, 256>}, {pipeline_mode = #tpu.pipeline_mode<synchronous>, transform_indices = @transform_2, window_bounds = array<i64: 1, 256>}, {pipeline_mode = #tpu.pipeline_mode<synchronous>, transform_indices = @transform_3, window_bounds = array<i64: 2, 32>}, {pipeline_mode = #tpu.pipeline_mode<synchronous>, transform_indices = @transform_4, window_bounds = array<i64: 2, 1>}, {pipeline_mode = #tpu.pipeline_mode<synchronous>, transform_indices = @transform_5, window_bounds = array<i64: 1, 1>}, {transform_indices = @transform_6, window_bounds = array<i64: 1, 128>}]} {
    %c0_i32 = arith.constant 0 : i32
    %0 = arith.cmpi eq, %arg0, %c0_i32 : i32
    %1 = arith.extui %0 : i1 to i32
    %c0_i32_0 = arith.constant 0 : i32
    %2 = arith.cmpi ne, %1, %c0_i32_0 : i32
    scf.if %2 {
      %c0_23 = arith.constant 0 : index
      %c0_24 = arith.constant 0 : index
      %57 = vector.load %arg1[%c0_23, %c0_24] : memref<128x32xbf16, #tpu.memory_space<vmem>>, vector<128x32xbf16>
      %c0_25 = arith.constant 0 : index
      %c0_26 = arith.constant 0 : index
      %58 = vector.load %arg2[%c0_25, %c0_26] : memref<32x256xbf16, #tpu.memory_space<vmem>>, vector<32x256xbf16>
      %cst_27 = arith.constant dense<0.000000e+00> : vector<128x256xf32>
      %59 = tpu.matmul %57, %58, %cst_27 {dimension_numbers = #tpu.dot_dimension_numbers<[1], [0], [0], [1], [0, 0, 1, 1], [], []>} : vector<128x32xbf16>, vector<32x256xbf16>, vector<128x256xf32> -> vector<128x256xf32>
      %c0_28 = arith.constant 0 : index
      %c0_29 = arith.constant 0 : index
      %60 = vector.load %arg3[%c0_28, %c0_29] : memref<1x256xf32, #tpu.memory_space<vmem>>, vector<1x256xf32>
      %61 = vector.broadcast %60 : vector<1x256xf32> to vector<128x256xf32>
      %62 = arith.addf %59, %61 : vector<128x256xf32>
      %63 = vector.extract_strided_slice %62 {offsets = [0, 0], sizes = [128, 128], strides = [1, 1]} : vector<128x256xf32> to vector<128x128xf32>
      %64 = arith.truncf %63 : vector<128x128xf32> to vector<128x128xbf16>
      %c0_30 = arith.constant 0 : index
      %c0_31 = arith.constant 0 : index
      %65 = vector.load %arg8[%c0_30, %c0_31] : memref<128x128xbf16, #tpu.memory_space<vmem>>, vector<128x128xbf16>
      tpu.vector_store %arg8[%c0_30, %c0_31], %64 {strides = array<i32>} : memref<128x128xbf16, #tpu.memory_space<vmem>>, vector<128x128xbf16>,
      %66 = vector.extract_strided_slice %62 {offsets = [0, 128], sizes = [128, 128], strides = [1, 1]} : vector<128x256xf32> to vector<128x128xf32>
      %67 = arith.truncf %66 : vector<128x128xf32> to vector<128x128xbf16>
      %c0_32 = arith.constant 0 : index
      %c0_33 = arith.constant 0 : index
      %68 = vector.load %arg9[%c0_32, %c0_33] : memref<128x128xbf16, #tpu.memory_space<vmem>>, vector<128x128xbf16>
      tpu.vector_store %arg9[%c0_32, %c0_33], %67 {strides = array<i32>} : memref<128x128xbf16, #tpu.memory_space<vmem>>, vector<128x128xbf16>,
      %c0_34 = arith.constant 0 : index
      %c0_35 = arith.constant 0 : index
      %69 = vector.load %arg4[%c0_34, %c0_35] : memref<2x32xbf16, #tpu.memory_space<vmem>>, vector<2x32xbf16>
      %cst_36 = arith.constant dense<0.000000e+00> : vector<2x128xf32>
      %70 = tpu.matmul %69, %57, %cst_36 {dimension_numbers = #tpu.dot_dimension_numbers<[1], [1], [0], [0], [0, 0, 1, 0], [], []>} : vector<2x32xbf16>, vector<128x32xbf16>, vector<2x128xf32> -> vector<2x128xf32>
      %c0_37 = arith.constant 0 : index
      %c0_38 = arith.constant 0 : index
      %71 = vector.load %arg5[%c0_37, %c0_38] : memref<2x1xf32, #tpu.memory_space<vmem>>, vector<2x1xf32>
      %72 = vector.broadcast %71 : vector<2x1xf32> to vector<2x128xf32>
      %73 = arith.addf %70, %72 : vector<2x128xf32>
      %c0_39 = arith.constant 0 : index
      %c0_40 = arith.constant 0 : index
      %74 = vector.load %arg10[%c0_39, %c0_40] : memref<2x128xf32, #tpu.memory_space<vmem>>, vector<2x128xf32>
      tpu.vector_store %arg10[%c0_39, %c0_40], %73 {strides = array<i32>} : memref<2x128xf32, #tpu.memory_space<vmem>>, vector<2x128xf32>,
    } else {
    }
    %c128_i32 = arith.constant 128 : i32
    %3 = arith.muli %arg0, %c128_i32 : i32
    %4 = tpu.assume_multiple %3, 128 : i32
    %5 = arith.index_cast %4 : i32 to index
    %c0 = arith.constant 0 : index
    %6 = vector.load %arg8[%5, %c0] : memref<128x128xbf16, #tpu.memory_space<vmem>>, vector<128x128xbf16>
    %7 = tpu.iota {dimensions = array<i32: 0>} : vector<128x1xi32>
    %c16_i32 = arith.constant 16 : i32
    %8 = vector.broadcast %c16_i32 : i32 to vector<128x1xi32>
    %9 = arith.cmpi slt, %7, %8 : vector<128x1xi32>
    %cst = arith.constant 0.000000e+00 : f32
    %10 = vector.broadcast %cst : f32 to vector<1x128xf32>
    %c0_1 = arith.constant 0 : index
    %c0_2 = arith.constant 0 : index
    %11 = vector.load %arg9[%c0_1, %c0_2] : memref<128x128xbf16, #tpu.memory_space<vmem>>, vector<128x64xbf16>
    %12 = vector.extract_strided_slice %6 {offsets = [0, 0], sizes = [128, 64], strides = [1, 1]} : vector<128x128xbf16> to vector<128x64xbf16>
    %cst_3 = arith.constant dense<0.000000e+00> : vector<128x128xf32>
    %13 = tpu.matmul %11, %12, %cst_3 {dimension_numbers = #tpu.dot_dimension_numbers<[1], [1], [0], [0], [0, 0, 1, 0], [], []>} : vector<128x64xbf16>, vector<128x64xbf16>, vector<128x128xf32> -> vector<128x128xf32>
    %cst_4 = arith.constant 1.250000e-01 : f32
    %14 = vector.broadcast %cst_4 : f32 to vector<128x128xf32>
    %15 = arith.mulf %13, %14 : vector<128x128xf32>
    %cst_5 = arith.constant -1.000000e+30 : f32
    %16 = vector.shape_cast %9 : vector<128x1xi1> to vector<128x1xi1>
    %17 = vector.broadcast %16 : vector<128x1xi1> to vector<128x128xi1>
    %18 = vector.broadcast %cst_5 : f32 to vector<128x128xf32>
    %19 = arith.select %17, %15, %18 : vector<128x128xi1>, vector<128x128xf32>
    %cst_6 = arith.constant dense<0xFF800000> : vector<128xf32>
    %20 = vector.multi_reduction <maximumf>, %19, %cst_6 [0] : vector<128x128xf32> to vector<128xf32>
    %21 = vector.shape_cast %20 : vector<128xf32> to vector<1x128xf32>
    %22 = vector.broadcast %21 : vector<1x128xf32> to vector<128x128xf32>
    %23 = arith.subf %19, %22 : vector<128x128xf32>
    %24 = math.exp %23 : vector<128x128xf32>
    %cst_7 = arith.constant dense<0.000000e+00> : vector<128xf32>
    %25 = vector.multi_reduction <add>, %24, %cst_7 [0] : vector<128x128xf32> to vector<128xf32>
    %26 = vector.shape_cast %25 : vector<128xf32> to vector<1x128xf32>
    %c0_8 = arith.constant 0 : index
    %c0_9 = arith.constant 0 : index
    %27 = vector.load %arg10[%c0_8, %c0_9] : memref<2x128xf32, #tpu.memory_space<vmem>>, vector<1x128xf32>
    %cst_10 = arith.constant dense<0.000000e+00> : vector<1x128xf32>
    %28 = tpu.matmul %27, %24, %cst_10 {dimension_numbers = #tpu.dot_dimension_numbers<[1], [0], [0], [1], [0, 0, 1, 1], [], []>} : vector<1x128xf32>, vector<128x128xf32>, vector<1x128xf32> -> vector<1x128xf32>
    %29 = tpu.reciprocal %26 {approx = true} : vector<1x128xf32> -> vector<1x128xf32>
    %30 = arith.mulf %28, %29 : vector<1x128xf32>
    %31 = arith.addf %10, %30 : vector<1x128xf32>
    %c0_11 = arith.constant 0 : index
    %c64 = arith.constant 64 : index
    %32 = vector.load %arg9[%c0_11, %c64] : memref<128x128xbf16, #tpu.memory_space<vmem>>, vector<128x64xbf16>
    %33 = vector.extract_strided_slice %6 {offsets = [0, 64], sizes = [128, 64], strides = [1, 1]} : vector<128x128xbf16> to vector<128x64xbf16>
    %cst_12 = arith.constant dense<0.000000e+00> : vector<128x128xf32>
    %34 = tpu.matmul %32, %33, %cst_12 {dimension_numbers = #tpu.dot_dimension_numbers<[1], [1], [0], [0], [0, 0, 1, 0], [], []>} : vector<128x64xbf16>, vector<128x64xbf16>, vector<128x128xf32> -> vector<128x128xf32>
    %cst_13 = arith.constant 1.250000e-01 : f32
    %35 = vector.broadcast %cst_13 : f32 to vector<128x128xf32>
    %36 = arith.mulf %34, %35 : vector<128x128xf32>
    %cst_14 = arith.constant -1.000000e+30 : f32
    %37 = vector.shape_cast %9 : vector<128x1xi1> to vector<128x1xi1>
    %38 = vector.broadcast %37 : vector<128x1xi1> to vector<128x128xi1>
    %39 = vector.broadcast %cst_14 : f32 to vector<128x128xf32>
    %40 = arith.select %38, %36, %39 : vector<128x128xi1>, vector<128x128xf32>
    %cst_15 = arith.constant dense<0xFF800000> : vector<128xf32>
    %41 = vector.multi_reduction <maximumf>, %40, %cst_15 [0] : vector<128x128xf32> to vector<128xf32>
    %42 = vector.shape_cast %41 : vector<128xf32> to vector<1x128xf32>
    %43 = vector.broadcast %42 : vector<1x128xf32> to vector<128x128xf32>
    %44 = arith.subf %40, %43 : vector<128x128xf32>
    %45 = math.exp %44 : vector<128x128xf32>
    %cst_16 = arith.constant dense<0.000000e+00> : vector<128xf32>
    %46 = vector.multi_reduction <add>, %45, %cst_16 [0] : vector<128x128xf32> to vector<128xf32>
    %47 = vector.shape_cast %46 : vector<128xf32> to vector<1x128xf32>
    %c1 = arith.constant 1 : index
    %c0_17 = arith.constant 0 : index
    %48 = vector.load %arg10[%c1, %c0_17] : memref<2x128xf32, #tpu.memory_space<vmem>>, vector<1x128xf32>
    %cst_18 = arith.constant dense<0.000000e+00> : vector<1x128xf32>
    %49 = tpu.matmul %48, %45, %cst_18 {dimension_numbers = #tpu.dot_dimension_numbers<[1], [0], [0], [1], [0, 0, 1, 1], [], []>} : vector<1x128xf32>, vector<128x128xf32>, vector<1x128xf32> -> vector<1x128xf32>
    %50 = tpu.reciprocal %47 {approx = true} : vector<1x128xf32> -> vector<1x128xf32>
    %51 = arith.mulf %49, %50 : vector<1x128xf32>
    %52 = arith.addf %31, %51 : vector<1x128xf32>
    %c0_19 = arith.constant 0 : index
    %c0_20 = arith.constant 0 : index
    %53 = vector.load %arg6[%c0_19, %c0_20] : memref<1x1xf32, #tpu.memory_space<vmem>>, vector<1x1xf32>
    %54 = vector.broadcast %53 : vector<1x1xf32> to vector<1x128xf32>
    %55 = arith.addf %52, %54 : vector<1x128xf32>
    %c0_21 = arith.constant 0 : index
    %c0_22 = arith.constant 0 : index
    %56 = vector.load %arg7[%c0_21, %c0_22] : memref<1x128xf32, #tpu.memory_space<vmem>>, vector<1x128xf32>
    tpu.vector_store %arg7[%c0_21, %c0_22], %55 {strides = array<i32>} : memref<1x128xf32, #tpu.memory_space<vmem>>, vector<1x128xf32>,
    return
  }
  func.func @transform_0(%arg0: i32) -> (i32, i32) {
    %c0_i32 = arith.constant 0 : i32
    %c0_i32_0 = arith.constant 0 : i32
    %c0_i32_1 = arith.constant 0 : i32
    return %c0_i32, %c0_i32_0 : i32, i32
  }
  func.func @transform_1(%arg0: i32) -> (i32, i32) {
    %c0_i32 = arith.constant 0 : i32
    %c0_i32_0 = arith.constant 0 : i32
    %c0_i32_1 = arith.constant 0 : i32
    return %c0_i32, %c0_i32_0 : i32, i32
  }
  func.func @transform_2(%arg0: i32) -> (i32, i32) {
    %c0_i32 = arith.constant 0 : i32
    %c0_i32_0 = arith.constant 0 : i32
    %c0_i32_1 = arith.constant 0 : i32
    return %c0_i32, %c0_i32_0 : i32, i32
  }
  func.func @transform_3(%arg0: i32) -> (i32, i32) {
    %c0_i32 = arith.constant 0 : i32
    %c0_i32_0 = arith.constant 0 : i32
    %c0_i32_1 = arith.constant 0 : i32
    return %c0_i32, %c0_i32_0 : i32, i32
  }
  func.func @transform_4(%arg0: i32) -> (i32, i32) {
    %c0_i32 = arith.constant 0 : i32
    %c0_i32_0 = arith.constant 0 : i32
    %c0_i32_1 = arith.constant 0 : i32
    return %c0_i32, %c0_i32_0 : i32, i32
  }
  func.func @transform_5(%arg0: i32) -> (i32, i32) {
    %c0_i32 = arith.constant 0 : i32
    %c0_i32_0 = arith.constant 0 : i32
    %c0_i32_1 = arith.constant 0 : i32
    return %c0_i32, %c0_i32_0 : i32, i32
  }
  func.func @transform_6(%arg0: i32) -> (i32, i32) {
    %c0_i32 = arith.constant 0 : i32
    %c0_i32_0 = arith.constant 0 : i32
    return %c0_i32, %arg0 : i32, i32
  }
}

</mosaic_0001>

<bundles_post_ra>
// kernel: tpu_custom_call.1
= control target key start
LH: loop header
LB: loop body
LE: loop exit
PB: predicated region body
PF: predicated region fallthrough
CT: control target
= control target key end

     0   :  { %s1612_s0 = inlined_call_operand.vmem [shape: bf16[128,32], index: 0, kind: input, shape index: {}]   ;;  %s1613_s1 = inlined_call_operand.vmem [shape: bf16[32,256], index: 1, kind: input, shape index: {}]   ;;  %s1614_s2 = inlined_call_operand.vmem [shape: f32[1,256], index: 2, kind: input, shape index: {}]   ;;  %s1615_s3 = inlined_call_operand.vmem [shape: bf16[2,32], index: 3, kind: input, shape index: {}]   ;;  %s1616_s4 = inlined_call_operand.vmem [shape: f32[2,1], index: 4, kind: input, shape index: {}]   ;;  %s1617_s5 = inlined_call_operand.<no memory space> [shape: f32[1,1], index: 5, kind: input, shape index: {}]   ;;  %s1618_s6 = inlined_call_operand.hbm [shape: f32[1,128], index: 6, kind: output, shape index: {}]  }
   0x1   :  { %v11_v0 = vstv %s1617_s5 }
   0x2   :  { %12 = vst [vmem:[#allocation5] sm:$0x1] %v11_v0 }
   0x3   :  { %v1098_v1 = vld [vmem:[%s1613_s1 + $0x10] sm:$0xf]  ;;  %v1212_v2 = vld [vmem:[%s1613_s1 + $0x14] sm:$0xf0]  ;;  %v1090_v3 = vld [vmem:[%s1613_s1] sm:$0xf] }
   0x4   :  { %v1099_v4 = vor.u32 %v1212_v2, %v1098_v1  ;;  %v1210_v5 = vld [vmem:[%s1613_s1 + $0x4] sm:$0xf0] }
   0x5   :  { %13 = vsyncpa [#allocation7], 0  ;;  %v1091_v6 = vor.u32 %v1210_v5, %v1090_v3  ;;  %v1428_v7 = vld [vmem:[%s1612_s0 + $0x20] sm:$0xff]  ;;  %vm117_vm0 = vcmask 261120   ;;  %v1442_v9 = vld [vmem:[%s1612_s0 + $0x28] sm:$0xff]  ;;  %vm478_vm1 = vcmask 523264  }
   0x6   :  { %1323 = vmatpush.bf16.msra.mxu2 %v1099_v4  ;;  %148 = vmatpush.bf16.msra.mxu1 %v1099_v4  ;;  %v1433_v8 = vld [vmem:[%s1612_s0] sm:$0xff]  ;;  %v1447_v10 = vld [vmem:[%s1612_s0 + $0x8] sm:$0xff]  ;;  %v1211_v11 = vld [vmem:[%s1613_s1 + $0x14] sm:$0xf]  ;;  %s1045_s11 = sshll.u32 %s1618_s6, 4  ;;  %s1046_s11 = int_to_ptr.hbm [resolvable:$true] %s1045_s11 }
   0x7   :  { %v1100_v12 = vld [vmem:[%s1613_s1 + $0x18] sm:$0xf0]  ;;  %v1209_v13 = vld [vmem:[%s1613_s1 + $0x4] sm:$0xf]  ;;  %v1092_v14 = vld [vmem:[%s1613_s1 + $0x8] sm:$0xf0] }
   0x8   :  { %v1103_v15 = vor.u32 %v1211_v11, %v1100_v12  ;;  %v1095_v16 = vor.u32 %v1209_v13, %v1092_v14  ;;  %v1468_v17 = vld [vmem:[%s1612_s0 + $0x30] sm:$0xff]  ;;  %v1482_v19 = vld [vmem:[%s1612_s0 + $0x38] sm:$0xff]  ;;  %v1504_v22 = vld [vmem:[%s1614_s2] sm:$0x3]  ;;  %s1372_s2 = smov 64  }
   0x9   :  { %v1473_v18 = vld [vmem:[%s1612_s0 + $0x10] sm:$0xff]  ;;  %v1487_v20 = vld [vmem:[%s1612_s0 + $0x18] sm:$0xff]  ;;  %v53_v23 = vperm.slane %v1504_v22, 0  ;;  %v1523_v12 = vperm.slane %v1504_v22, 1 }
   0xa   :  { %1324 = vmatpush.bf16.msra.mxu2 %v1091_v6  ;;  %149 = vmatpush.bf16.msra.mxu1 %v1091_v6 }
   0xd   :  { %1108 = vmatmul.msk.bf16.vlgmr.msra.gmra.mxu2 %vm117_vm0, %v1428_v7  ;;  %1104 = vmatmul.msk.bf16.vlgmr.msra.gmra.mxu1 %vm117_vm0, %v1433_v8 }
   0xe   :  { %197 = vmatpush.bf16.msrb.mxu1 %v1103_v15 }
  0x12   :  { %198 = vmatpush.bf16.msrb.mxu1 %v1095_v16 }
  0x1d   :  { %1109 = vmatmul.msk.bf16.gmra.mxu2 %vm117_vm0, %v1442_v9  ;;  %1105 = vmatmul.msk.bf16.gmra.mxu1 %vm117_vm0, %v1447_v10 }
  0x2d   :  { %1110 = vmatmul.msk.bf16.gmra.mxu2 %vm117_vm0, %v1468_v17  ;;  %1106 = vmatmul.msk.bf16.gmra.mxu1 %vm117_vm0, %v1473_v18 }
  0x3d   :  { %1111 = vmatmul.msk.bf16.gmra.mxu2 %vm117_vm0, %v1482_v19  ;;  %1107 = vmatmul.msk.bf16.gmra.mxu1 %vm117_vm0, %v1487_v20 }
  0x4d   :  { %1112 = vmatmul.msk.bf16.vlgmr.msrb.gmra.mxu1 %vm117_vm0, %v1433_v8 }
  0x5d   :  { %1113 = vmatmul.msk.bf16.gmra.mxu1 %vm117_vm0, %v1447_v10 }
  0x6d   :  { %1114 = vmatmul.msk.bf16.gmra.mxu1 %vm117_vm0, %v1473_v18 }
  0x7d   :  { %1115 = vmatmul.msk.bf16.gmra.mxu1 %vm117_vm0, %v1487_v20 }
  0x8a   :  { %v151_v21 = vpop.f32.mrf.mxu1 }
  0x8b   :  { %v152_v25 = vadd.f32 %v151_v21, %v53_v23 }
  0x8d   :  { %1116 = vmatmul.msk.bf16.gmra.mxu1 %vm117_vm0, %v1428_v7 }
  0x90   :  { %v171_v24 = vpop.f32.mrf.mxu2 }
  0x91   :  { %v172_v30 = vadd.f32 %v171_v24, %v53_v23 }
  0x92   :  { %v153_v26 = vpop.f32.mrf.mxu1 }
  0x93   :  { %v154_v27 = vadd.f32 %v153_v26, %v53_v23 }
  0x95   :  { %v1232_v28 = vpack.c.bf16 %v154_v27, %v152_v25  ;;  %v140_v27 = vsel %vm117_vm0, %v1482_v19, 0 }
  0x96   :  { %314 = vmatpush.bf16.xpose.msrb.mxu2 %v140_v27 }
  0x97   :  { %1233 = vst [vmem:[#allocation2 + $0x30] sm:$0xff] %v1232_v28   ;;  %v137_v28 = vsel %vm117_vm0, %v1468_v17, 0 }
  0x98   :  { %v173_v29 = vpop.f32.mrf.mxu2 }
  0x99   :  { %v174_v31 = vadd.f32 %v173_v29, %v53_v23 }
  0x9a   :  { %v156_v32 = vpop.f32.mrf.mxu1 }
  0x9b   :  { %v1252_v33 = vpack.c.bf16 %v174_v31, %v172_v30  ;;  %v157_v35 = vadd.f32 %v156_v32, %v53_v23  ;;  %v134_v30 = vsel %vm117_vm0, %v1442_v9, 0  ;;  %v131_v32 = vsel %vm117_vm0, %v1428_v7, 0 }
  0x9d   :  { %1312 = vst [vmem:[#allocation2 + $0x8] sm:$0xff] %v1252_v33   ;;  %1117 = vmatmul.msk.bf16.gmra.mxu1 %vm117_vm0, %v1442_v9  ;;  %v125_v9 = vsel %vm117_vm0, %v1473_v18, 0  ;;  %v304_v18 = vld [vmem:[%s1615_s3] sm:$0x1] }
  0x9e   :  { %v1213_v58 = vld [vmem:[#allocation2 + $0x30] sm:$0xff]  ;;  %315 = vmatpush.bf16.xpose.msrb.mxu2 %v137_v28 }
  0xa0   :  { %v176_v34 = vpop.f32.mrf.mxu2 }
  0xa1   :  { %v177_v40 = vadd.f32 %v176_v34, %v53_v23  ;;  %v122_v34 = vsel %vm117_vm0, %v1447_v10, 0 }
  0xa2   :  { %v158_v36 = vpop.f32.mrf.mxu1 }
  0xa3   :  { %v159_v37 = vadd.f32 %v158_v36, %v53_v23 }
  0xa4   :  { %v1217_v55 = vld [vmem:[#allocation2 + $0x8] sm:$0xff] }
  0xa5   :  { %v1237_v38 = vpack.c.bf16 %v159_v37, %v157_v35  ;;  %v516_v22 = vsel %vm478_vm1, %v1217_v55, 0 }
  0xa6   :  { %316 = vmatpush.bf16.xpose.msrb.mxu2 %v134_v30 }
  0xa7   :  { %1309 = vst [vmem:[#allocation2] sm:$0xff] %v1237_v38  }
  0xa8   :  { %v178_v39 = vpop.f32.mrf.mxu2 }
  0xa9   :  { %v179_v41 = vadd.f32 %v178_v39, %v53_v23 }
  0xaa   :  { %v161_v42 = vpop.f32.mrf.mxu1 }
  0xab   :  { %v1257_v43 = vpack.c.bf16 %v179_v41, %v177_v40  ;;  %v162_v45 = vadd.f32 %v161_v42, %v53_v23 }
  0xad   :  { %1313 = vst [vmem:[#allocation2 + $0x20] sm:$0xff] %v1257_v43   ;;  %1118 = vmatmul.msk.bf16.gmra.mxu1 %vm117_vm0, %v1468_v17  ;;  %v128_v17 = vsel %vm117_vm0, %v1487_v20, 0  ;;  %v119_v20 = vsel %vm117_vm0, %v1433_v8, 0 }
  0xae   :  { %v1214_v21 = vld [vmem:[#allocation2] sm:$0xff]  ;;  %317 = vmatpush.bf16.xpose.msrb.mxu2 %v131_v32 }
  0xaf   :  { %v507_v31 = vsel %vm478_vm1, %v1214_v21, 0 }
  0xb0   :  { %v181_v44 = vpop.f32.mrf.mxu2 }
  0xb1   :  { %v182_v51 = vadd.f32 %v181_v44, %v53_v23 }
  0xb2   :  { %v163_v46 = vpop.f32.mrf.mxu1 }
  0xb3   :  { %v164_v47 = vadd.f32 %v163_v46, %v53_v23 }
  0xb4   :  { %v1218_v48 = vld [vmem:[#allocation2 + $0x20] sm:$0xff] }
  0xb5   :  { %v1242_v49 = vpack.c.bf16 %v164_v47, %v162_v45  ;;  %780 = vrot.lane.b32.xlu1 %v1218_v48, %s1372_s2  ;;  %v519_v24 = vsel %vm478_vm1, %v1218_v48, 0 }
  0xb6   :  { %318 = vmatpush.bf16.xpose.msrb.mxu2 %v128_v17 }
  0xb7   :  { %1310 = vst [vmem:[#allocation2 + $0x18] sm:$0xff] %v1242_v49  }
  0xb8   :  { %v183_v50 = vpop.f32.mrf.mxu2 }
  0xb9   :  { %v184_v52 = vadd.f32 %v183_v50, %v53_v23 }
  0xba   :  { %v166_v53 = vpop.f32.mrf.mxu1 }
  0xbb   :  { %v1262_v54 = vpack.c.bf16 %v184_v52, %v182_v51  ;;  %v167_v57 = vadd.f32 %v166_v53, %v53_v23 }
  0xbd   :  { %1314 = vst [vmem:[#allocation2 + $0x28] sm:$0xff] %v1262_v54   ;;  %1119 = vmatmul.msk.bf16.gmra.mxu1 %vm117_vm0, %v1482_v19  ;;  %778 = vrot.lane.b32.xlu1 %v1217_v55, %s1372_s2  ;;  %v504_v19 = vsel %vm478_vm1, %v1213_v58, 0  ;;  %v1373_v55 = vmov 0  }
  0xbe   :  { %v1215_v4 = vld [vmem:[#allocation2 + $0x18] sm:$0xff]  ;;  %319 = vmatpush.bf16.xpose.msrb.mxu2 %v125_v9  ;;  %1328 = vset.pattern.permute.xlu2 %v1373_v55 }
  0xbf   :  { %v510_v29 = vsel %vm478_vm1, %v1215_v4, 0  ;;  %1329 = vset.pattern.permute.xlu0 %v1373_v55 }
  0xc0   :  { %v186_v56 = vpop.f32.mrf.mxu2 }
  0xc1   :  { %v187_v63 = vadd.f32 %v186_v56, %v53_v23  ;;  %v305_v56 = vld [vmem:[%s1616_s4] sm:$0x3]  ;;  %s1374_s4 = smov [#allocation6]  }
  0xc2   :  { %v168_v59 = vpop.f32.mrf.mxu1  ;;  %s1043_s8 = sshll.u32 %s1374_s4, 4  ;;  %s1044_s8 = int_to_ptr.vmem [resolvable:$true] %s1043_s8 }
  0xc3   :  { %v169_v60 = vadd.f32 %v168_v59, %v53_v23 }
  0xc4   :  { %v1219_v11 = vld [vmem:[#allocation2 + $0x28] sm:$0xff] }
  0xc5   :  { %v1247_v61 = vpack.c.bf16 %v169_v60, %v167_v57  ;;  %770 = vrot.lane.b32.xlu1 %v1213_v58, %s1372_s2  ;;  %v522_v13 = vsel %vm478_vm1, %v1219_v11, 0 }
  0xc6   :  { %320 = vmatpush.bf16.xpose.msrb.mxu2 %v122_v34 }
  0xc7   :  { %1311 = vst [vmem:[#allocation2 + $0x10] sm:$0xff] %v1247_v61  }
  0xc8   :  { %v188_v62 = vpop.f32.mrf.mxu2 }
  0xc9   :  { %v189_v0 = vadd.f32 %v188_v62, %v53_v23 }
  0xca   :  { %v200_v6 = vpop.f32.mrf.mxu1 }
  0xcb   :  { %v1267_v1 = vpack.c.bf16 %v189_v0, %v187_v63  ;;  %v201_v14 = vadd.f32 %v200_v6, %v1523_v12 }
  0xcd   :  { %1315 = vst [vmem:[#allocation2 + $0x38] sm:$0xff] %v1267_v1  }
  0xce   :  { %v1216_v2 = vld [vmem:[#allocation2 + $0x10] sm:$0xff]  ;;  %321 = vmatpush.bf16.xpose.msrb.mxu2 %v119_v20 }
  0xcf   :  { %776 = vrot.lane.b32.xlu2 %v1216_v2, %s1372_s2  ;;  %v513_v26 = vsel %vm478_vm1, %v1216_v2, 0 }
  0xd2   :  { %v202_v15 = vpop.f32.mrf.mxu1 }
  0xd3   :  { %v203_v16 = vadd.f32 %v202_v15, %v1523_v12 }
  0xd4   :  { %v1220_v3 = vld [vmem:[#allocation2 + $0x38] sm:$0xff] }
  0xd5   :  { %784 = vrot.lane.b32.xlu0 %v1220_v3, %s1372_s2  ;;  %v525_v5 = vsel %vm478_vm1, %v1220_v3, 0  ;;  %v1272_v23 = vpack.c.bf16 %v203_v16, %v201_v14  ;;  %1120 = vmatmul.msk.bf16.vlgmr.msrb.gmra.mxu2 %vm117_vm0, %v304_v18 }
  0xd6   :  { %527 = vmatpush.bf16.xpose.msra.mxu3 %v525_v5 }
  0xd7   :  { %774 = vrot.lane.b32.xlu2 %v1215_v4, %s1372_s2  ;;  %1273 = vst [vmem:[#allocation3] sm:$0xff] %v1272_v23  }
  0xda   :  { %v205_v33 = vpop.f32.mrf.mxu1 }
  0xdb   :  { %v206_v7 = vadd.f32 %v205_v33, %v1523_v12 }
  0xdd   :  { %782 = vrot.lane.b32.xlu0 %v1219_v11, %s1372_s2 }
  0xde   :  { %528 = vmatpush.bf16.xpose.msra.mxu3 %v522_v13  ;;  %v1221_v25 = vld [vmem:[#allocation3] sm:$0xff] }
  0xdf   :  { %754 = vrot.lane.b32.xlu2 %v1221_v25, %s1372_s2 }
  0xe2   :  { %v207_v35 = vpop.f32.mrf.mxu1 }
  0xe3   :  { %v208_v36 = vadd.f32 %v207_v35, %v1523_v12 }
  0xe5   :  { %772 = vrot.lane.b32.xlu0 %v1214_v21, %s1372_s2  ;;  %v1277_v37 = vpack.c.bf16 %v208_v36, %v206_v7 }
  0xe6   :  { %529 = vmatpush.bf16.xpose.msra.mxu3 %v519_v24 }
  0xe7   :  { %1316 = vst [vmem:[#allocation3 + $0x18] sm:$0xff] %v1277_v37  }
  0xea   :  { %v210_v38 = vpop.f32.mrf.mxu1 }
  0xeb   :  { %v211_v10 = vadd.f32 %v210_v38, %v1523_v12 }
  0xee   :  { %530 = vmatpush.bf16.xpose.msra.mxu3 %v516_v22  ;;  %v1222_v41 = vld [vmem:[#allocation3 + $0x18] sm:$0xff] }
  0xef   :  { %756 = vrot.lane.b32.xlu0 %v1222_v41, %s1372_s2 }
  0xf2   :  { %v212_v39 = vpop.f32.mrf.mxu1 }
  0xf3   :  { %v213_v40 = vadd.f32 %v212_v39, %v1523_v12 }
  0xf5   :  { %v1282_v42 = vpack.c.bf16 %v213_v40, %v211_v10 }
  0xf6   :  { %531 = vmatpush.bf16.xpose.msra.mxu3 %v513_v26 }
  0xf7   :  { %1317 = vst [vmem:[#allocation3 + $0x10] sm:$0xff] %v1282_v42  }
  0xfa   :  { %v215_v8 = vpop.f32.mrf.mxu1 }
  0xfb   :  { %v216_v43 = vadd.f32 %v215_v8, %v1523_v12 }
  0xfe   :  { %532 = vmatpush.bf16.xpose.msra.mxu3 %v510_v29  ;;  %v1223_v48 = vld [vmem:[#allocation3 + $0x10] sm:$0xff] }
  0xff   :  { %758 = vrot.lane.b32.xlu1 %v1223_v48, %s1372_s2 }
 0x102   :  { %v217_v45 = vpop.f32.mrf.mxu1 }
 0x103   :  { %v218_v47 = vadd.f32 %v217_v45, %v1523_v12 }
 0x105   :  { %v1287_v49 = vpack.c.bf16 %v218_v47, %v216_v43 }
 0x106   :  { %533 = vmatpush.bf16.xpose.msra.mxu3 %v507_v31 }
 0x107   :  { %1318 = vst [vmem:[#allocation3 + $0x20] sm:$0xff] %v1287_v49  }
 0x10a   :  { %v220_v61 = vpop.f32.mrf.mxu1 }
 0x10b   :  { %v221_v63 = vadd.f32 %v220_v61, %v1523_v12 }
 0x10e   :  { %534 = vmatpush.bf16.xpose.msra.mxu3 %v504_v19  ;;  %v1224_v53 = vld [vmem:[#allocation3 + $0x20] sm:$0xff] }
 0x10f   :  { %760 = vrot.lane.b32.xlu2 %v1224_v53, %s1372_s2 }
 0x112   :  { %v222_v1 = vpop.f32.mrf.mxu1 }
 0x113   :  { %v223_v2 = vadd.f32 %v222_v1, %v1523_v12 }
 0x115   :  { %1185 = vmatmul.msk.bf16.vlgmr.msra.gmra.mxu3 %vm478_vm1, %v1221_v25  ;;  %v1292_v3 = vpack.c.bf16 %v223_v2, %v221_v63 }
 0x117   :  { %308 = vperm.xlu2 %1328, %v305_v56   ;;  %1319 = vst [vmem:[#allocation3 + $0x28] sm:$0xff] %v1292_v3  }
 0x11a   :  { %v225_v11 = vpop.f32.mrf.mxu1 }
 0x11b   :  { %v226_v15 = vadd.f32 %v225_v11, %v1523_v12 }
 0x11e   :  { %v1225_v14 = vld [vmem:[#allocation3 + $0x28] sm:$0xff] }
 0x11f   :  { %762 = vrot.lane.b32.xlu0 %v1225_v14, %s1372_s2 }
 0x122   :  { %v227_v21 = vpop.f32.mrf.mxu1 }
 0x123   :  { %v228_v23 = vadd.f32 %v227_v21, %v1523_v12 }
 0x125   :  { %1186 = vmatmul.msk.bf16.gmra.mxu3 %vm478_vm1, %v1222_v41  ;;  %v1297_v24 = vpack.c.bf16 %v228_v23, %v226_v15 }
 0x127   :  { %v781_v52 = vpop.permute.xlu1 %780  ;;  %1320 = vst [vmem:[#allocation3 + $0x8] sm:$0xff] %v1297_v24  }
 0x128   :  { %v826_v54 = vsel %vm478_vm1, %v781_v52, 0 }
 0x129   :  { %v777_v59 = vpop.permute.xlu2 %776 }
 0x12a   :  { %v820_v60 = vsel %vm478_vm1, %v777_v59, 0  ;;  %v230_v22 = vpop.f32.mrf.mxu1 }
 0x12b   :  { %v231_v28 = vadd.f32 %v230_v22, %v1523_v12 }
 0x12e   :  { %v1226_v25 = vld [vmem:[#allocation3 + $0x8] sm:$0xff] }
 0x12f   :  { %v779_v57 = vpop.permute.xlu1 %778  ;;  %764 = vrot.lane.b32.xlu1 %v1226_v25, %s1372_s2 }
 0x130   :  { %v823_v58 = vsel %vm478_vm1, %v779_v57, 0 }
 0x131   :  { %v775_v62 = vpop.permute.xlu2 %774 }
 0x132   :  { %v817_v0 = vsel %vm478_vm1, %v775_v62, 0  ;;  %v232_v26 = vpop.f32.mrf.mxu1  ;;  %v1029_v62 = vld [vmem:[#allocation5] sm:$0x1] }
 0x133   :  { %v233_v29 = vadd.f32 %v232_v26, %v1523_v12  ;;  %1032 = vperm.xlu2 %1328, %v1029_v62  }
 0x135   :  { %1187 = vmatmul.msk.bf16.gmra.mxu3 %vm478_vm1, %v1223_v48  ;;  %v1302_v31 = vpack.c.bf16 %v233_v29, %v231_v28 }
 0x137   :  { %v771_v6 = vpop.permute.xlu1 %770  ;;  %1321 = vst [vmem:[#allocation3 + $0x30] sm:$0xff] %v1302_v31  }
 0x138   :  { %v811_v13 = vsel %vm478_vm1, %v771_v6, 0 }
 0x139   :  { %v755_v16 = vpop.permute.xlu2 %754 }
 0x13a   :  { %v235_v19 = vpop.f32.mrf.mxu1 }
 0x13b   :  { %v236_v38 = vadd.f32 %v235_v19, %v1523_v12 }
 0x13e   :  { %v1227_v7 = vld [vmem:[#allocation3 + $0x30] sm:$0xff] }
 0x13f   :  { %766 = vrot.lane.b32.xlu0 %v1227_v7, %s1372_s2 }
 0x142   :  { %v237_v20 = vpop.f32.mrf.mxu1 }
 0x143   :  { %v238_v18 = vadd.f32 %v237_v20, %v1523_v12 }
 0x145   :  { %1188 = vmatmul.msk.bf16.gmra.mxu3 %vm478_vm1, %v1224_v53  ;;  %v1307_v39 = vpack.c.bf16 %v238_v18, %v236_v38 }
 0x147   :  { %v785_v44 = vpop.permute.xlu0 %784  ;;  %1322 = vst [vmem:[#allocation3 + $0x38] sm:$0xff] %v1307_v39  }
 0x148   :  { %v832_v46 = vsel %vm478_vm1, %v785_v44, 0 }
 0x149   :  { %834 = vmatpush.bf16.xpose.msra.mxu0 %v832_v46 }
 0x14e   :  { %v1228_v46 = vld [vmem:[#allocation3 + $0x38] sm:$0xff] }
 0x14f   :  { %v783_v50 = vpop.permute.xlu0 %782  ;;  %768 = vrot.lane.b32.xlu1 %v1228_v46, %s1372_s2 }
 0x150   :  { %v829_v51 = vsel %vm478_vm1, %v783_v50, 0 }
 0x151   :  { %835 = vmatpush.bf16.xpose.msra.mxu0 %v829_v51 }
 0x155   :  { %1189 = vmatmul.msk.bf16.gmra.mxu3 %vm478_vm1, %v1225_v14 }
 0x157   :  { %v773_v4 = vpop.permute.xlu0 %772 }
 0x158   :  { %v814_v5 = vsel %vm478_vm1, %v773_v4, 0  ;;  %v323_v12 = vpop.f32.mrf.mxu2 }
 0x159   :  { %836 = vmatpush.bf16.xpose.msra.mxu0 %v826_v54 }
 0x160   :  { %v325_v59 = vpop.f32.mrf.mxu2 }
 0x161   :  { %837 = vmatpush.bf16.xpose.msra.mxu0 %v823_v58  ;;  %v757_v8 = vpop.permute.xlu0 %756 }
 0x165   :  { %1190 = vmatmul.msk.bf16.gmra.mxu3 %vm478_vm1, %v1226_v25 }
 0x169   :  { %838 = vmatpush.bf16.xpose.msra.mxu0 %v820_v60  ;;  %v761_v44 = vpop.permute.xlu2 %760 }
 0x171   :  { %839 = vmatpush.bf16.xpose.msra.mxu0 %v817_v0  ;;  %v309_v52 = vpop.permute.xlu2 %308  ;;  %v759_v57 = vpop.permute.xlu1 %758 }
 0x172   :  { %v324_v56 = vadd.f32 %v323_v12, %v309_v52 }
 0x174   :  { %327 = vst [vmem:[#allocation4] sm:$0x3] %v324_v56 }
 0x175   :  { %1191 = vmatmul.msk.bf16.gmra.mxu3 %vm478_vm1, %v1227_v7 }
 0x179   :  { %840 = vmatpush.bf16.xpose.msra.mxu0 %v814_v5 }
 0x17b   :  { %v730_v28 = vld [vmem:[#allocation4] sm:$0x1] }
 0x181   :  { %841 = vmatpush.bf16.xpose.msra.mxu0 %v811_v13 }
 0x185   :  { %1192 = vmatmul.msk.bf16.gmra.mxu3 %vm478_vm1, %v1228_v46 }
 0x188   :  { %1193 = vmatmul.msk.bf16.vlgmr.msra.gmra.mxu0 %vm478_vm1, %v755_v16 }
 0x198   :  { %v536_v27 = vpop.f32.mrf.mxu3  ;;  %1194 = vmatmul.msk.bf16.gmra.mxu0 %vm478_vm1, %v757_v8 }
 0x199   :  { %v576_v30 = vmul.f32 0.125, %v536_v27 }
 0x19b   :  { %v640_v32 = vmax.f32 %v576_v30, -1e+30 }
 0x19d   :  { %v644_v9 = vmax.f32 %v640_v32, -1e+30 }
 0x19f   :  { %v648_v35 = vmax.f32 %v644_v9, -1e+30 }
 0x1a0   :  { %v538_v17 = vpop.f32.mrf.mxu3 }
 0x1a1   :  { %v577_v33 = vmul.f32 0.125, %v538_v17  ;;  %v765_v32 = vpop.permute.xlu1 %764 }
 0x1a3   :  { %v641_v34 = vmax.f32 %v577_v33, -1e+30 }
 0x1a5   :  { %v645_v36 = vmax.f32 %v641_v34, -1e+30 }
 0x1a7   :  { %v649_v37 = vmax.f32 %v645_v36, -1e+30 }
 0x1a8   :  { %v541_v58 = vpop.f32.mrf.mxu3  ;;  %1195 = vmatmul.msk.bf16.gmra.mxu0 %vm478_vm1, %v759_v57 }
 0x1a9   :  { %v652_v10 = vmax.f32 %v648_v35, %v649_v37 }
 0x1ab   :  { %v654_v40 = vmax.f32 %v652_v10, -1e+30 }
 0x1ad   :  { %v655_v41 = vrot.slane %v654_v40, 4 }
 0x1af   :  { %v656_v42 = vmax.f32 %v654_v40, %v655_v41 }
 0x1b0   :  { %v543_v1 = vpop.f32.mrf.mxu3 }
 0x1b1   :  { %v657_v43 = vrot.slane %v656_v42, 2 }
 0x1b3   :  { %v658_v45 = vmax.f32 %v656_v42, %v657_v43 }
 0x1b5   :  { %v659_v47 = vrot.slane %v658_v45, 1 }
 0x1b7   :  { %v660_v48 = vmax.f32 %v658_v45, %v659_v47 }
 0x1b8   :  { %v546_v6 = vpop.f32.mrf.mxu3  ;;  %1196 = vmatmul.msk.bf16.gmra.mxu0 %vm478_vm1, %v761_v44 }
 0x1b9   :  { %v661_v49 = vsub.f32 %v576_v30, %v660_v48  ;;  %v662_v50 = vsub.f32 %v577_v33, %v660_v48  ;;  %v663_v51 = vsub.f32 -1e+30, %v660_v48  ;;  %v763_v30 = vpop.permute.xlu0 %762 }
 0x1bb   :  { %v677_v53 = vmul.f32 1.442695, %v661_v49  ;;  %v679_v54 = vmul.f32 1.442695, %v662_v50  ;;  %v681_v55 = vmul.f32 1.442695, %v663_v51 }
 0x1bd   :  { %1330 = vpow2.f32 %v677_v53 }
 0x1be   :  { %1332 = vpow2.f32 %v679_v54 }
 0x1bf   :  { %1334 = vpow2.f32 %v681_v55 }
 0x1c0   :  { %v548_v16 = vpop.f32.mrf.mxu3 }
 0x1c1   :  { %v767_v10 = vpop.permute.xlu0 %766  ;;  %v769_v49 = vpop.permute.xlu1 %768 }
 0x1c3   :  { %v1331_v60 = vpop.eup %1330 }
 0x1c4   :  { %v1333_v61 = vpop.eup %1332 }
 0x1c5   :  { %v1335_v63 = vpop.eup %1334  ;;  %v709_v0 = vadd.f32 %v1333_v61, %v1331_v60 }
 0x1c6   :  { %731 = vmatpush.msra.mxu2 %v1335_v63 }
 0x1c7   :  { %v710_v2 = vadd.f32 %v1335_v63, %v709_v0 }
 0x1c8   :  { %732 = vmatpush.msra.mxu2 %v1335_v63  ;;  %v551_v25 = vpop.f32.mrf.mxu3  ;;  %1197 = vmatmul.msk.bf16.gmra.mxu0 %vm478_vm1, %v763_v30 }
 0x1c9   :  { %v711_v3 = vadd.f32 %v1335_v63, %v710_v2  ;;  %v1005_v25 = vld [vmem:[#allocation4 + $0x1] sm:$0x1] }
 0x1ca   :  { %733 = vmatpush.msra.mxu2 %v1335_v63 }
 0x1cb   :  { %v712_v4 = vadd.f32 %v1335_v63, %v711_v3 }
 0x1cc   :  { %734 = vmatpush.msra.mxu2 %v1335_v63 }
 0x1cd   :  { %v713_v5 = vadd.f32 %v1335_v63, %v712_v4 }
 0x1ce   :  { %735 = vmatpush.msra.mxu2 %v1335_v63 }
 0x1cf   :  { %v714_v11 = vadd.f32 %v1335_v63, %v713_v5 }
 0x1d0   :  { %736 = vmatpush.msra.mxu2 %v1335_v63  ;;  %v553_v29 = vpop.f32.mrf.mxu3 }
 0x1d1   :  { %v715_v13 = vadd.f32 %v1335_v63, %v714_v11 }
 0x1d2   :  { %737 = vmatpush.msra.mxu2 %v1335_v63 }
 0x1d3   :  { %v716_v14 = vadd.f32 %v1335_v63, %v715_v13 }
 0x1d4   :  { %738 = vmatpush.msra.mxu2 %v1335_v63 }
 0x1d5   :  { %v717_v15 = vadd.f32 %v1335_v63, %v716_v14 }
 0x1d6   :  { %739 = vmatpush.msra.mxu2 %v1335_v63 }
 0x1d7   :  { %v718_v21 = vadd.f32 %v1335_v63, %v717_v15 }
 0x1d8   :  { %740 = vmatpush.msra.mxu2 %v1335_v63  ;;  %v556_v17 = vpop.f32.mrf.mxu3  ;;  %1198 = vmatmul.msk.bf16.gmra.mxu0 %vm478_vm1, %v765_v32 }
 0x1d9   :  { %v719_v23 = vadd.f32 %v1335_v63, %v718_v21 }
 0x1da   :  { %741 = vmatpush.msra.mxu2 %v1335_v63 }
 0x1db   :  { %v720_v24 = vadd.f32 %v1335_v63, %v719_v23 }
 0x1dc   :  { %742 = vmatpush.msra.mxu2 %v1335_v63 }
 0x1dd   :  { %v721_v22 = vadd.f32 %v1335_v63, %v720_v24 }
 0x1de   :  { %743 = vmatpush.msra.mxu2 %v1335_v63 }
 0x1df   :  { %v722_v26 = vadd.f32 %v1335_v63, %v721_v22 }
 0x1e0   :  { %744 = vmatpush.msra.mxu2 %v1335_v63  ;;  %v558_v36 = vpop.f32.mrf.mxu3 }
 0x1e1   :  { %v1601_v27 = vadd.f32 %v1335_v63, %v722_v26 }
 0x1e2   :  { %745 = vmatpush.msra.mxu2 %v1333_v61 }
 0x1e4   :  { %746 = vmatpush.msra.mxu2 %v1331_v60 }
 0x1e5   :  { %747 = vmatmul.f32.vlgmr.msra.gmra.mxu2 %v730_v28 }
 0x1e8   :  { %v561_v40 = vpop.f32.mrf.mxu3  ;;  %1199 = vmatmul.msk.bf16.gmra.mxu0 %vm478_vm1, %v767_v10 }
 0x1f0   :  { %v563_v44 = vpop.f32.mrf.mxu3 }
 0x1f8   :  { %v566_v53 = vpop.f32.mrf.mxu3  ;;  %1200 = vmatmul.msk.bf16.gmra.mxu0 %vm478_vm1, %v769_v49 }
 0x200   :  { %v568_v56 = vpop.f32.mrf.mxu3 }
 0x205   :  { %v843_v31 = vpop.f32.mrf.mxu0 }
 0x206   :  { %v883_v19 = vmul.f32 0.125, %v843_v31 }
 0x208   :  { %v915_v9 = vmax.f32 %v883_v19, -1e+30  ;;  %v571_v0 = vpop.f32.mrf.mxu3 }
 0x20a   :  { %v919_v7 = vmax.f32 %v915_v9, -1e+30 }
 0x20c   :  { %v923_v20 = vmax.f32 %v919_v7, -1e+30 }
 0x20d   :  { %v845_v33 = vpop.f32.mrf.mxu0 }
 0x20e   :  { %v884_v34 = vmul.f32 0.125, %v845_v33  ;;  %v724_v33 = vrot.slane %v1601_v27, 4 }
 0x210   :  { %v916_v35 = vmax.f32 %v884_v34, -1e+30  ;;  %v573_v6 = vpop.f32.mrf.mxu3  ;;  %v725_v7 = vadd.f32 %v724_v33, %v1601_v27 }
 0x212   :  { %v920_v37 = vmax.f32 %v916_v35, -1e+30  ;;  %v726_v36 = vrot.slane %v725_v7, 2 }
 0x214   :  { %v924_v38 = vmax.f32 %v920_v37, -1e+30 }
 0x215   :  { %v848_v54 = vpop.f32.mrf.mxu0 }
 0x216   :  { %v927_v18 = vmax.f32 %v923_v20, %v924_v38  ;;  %v727_v20 = vadd.f32 %v726_v36, %v725_v7 }
 0x218   :  { %v929_v39 = vmax.f32 %v927_v18, -1e+30  ;;  %v728_v18 = vrot.slane %v727_v20, 1 }
 0x21a   :  { %v930_v41 = vrot.slane %v929_v39, 4 }
 0x21c   :  { %v931_v42 = vmax.f32 %v929_v39, %v930_v41  ;;  %v729_v39 = vadd.f32 %v728_v18, %v727_v20 }
 0x21d   :  { %v850_v61 = vpop.f32.mrf.mxu0 }
 0x21e   :  { %v932_v8 = vrot.slane %v931_v42, 2 }
 0x220   :  { %v933_v43 = vmax.f32 %v931_v42, %v932_v8 }
 0x222   :  { %v934_v45 = vrot.slane %v933_v43, 1 }
 0x224   :  { %v935_v46 = vmax.f32 %v933_v43, %v934_v45  ;;  %v1033_v43 = vpop.permute.xlu2 %1032 }
 0x225   :  { %v853_v3 = vpop.f32.mrf.mxu0  ;;  %v1035_v27 = vperm.slane %v1033_v43, 0 }
 0x226   :  { %v936_v47 = vsub.f32 %v883_v19, %v935_v46  ;;  %v937_v48 = vsub.f32 %v884_v34, %v935_v46  ;;  %v938_v12 = vsub.f32 -1e+30, %v935_v46 }
 0x228   :  { %v952_v50 = vmul.f32 1.442695, %v936_v47  ;;  %v954_v51 = vmul.f32 1.442695, %v937_v48  ;;  %v956_v52 = vmul.f32 1.442695, %v938_v12 }
 0x22a   :  { %1336 = vpow2.f32 %v952_v50 }
 0x22b   :  { %1338 = vpow2.f32 %v954_v51 }
 0x22c   :  { %1340 = vpow2.f32 %v956_v52 }
 0x22d   :  { %v855_v14 = vpop.f32.mrf.mxu0  ;;  %1342 = vrcp.f32 %v729_v39 }
 0x230   :  { %v1337_v55 = vpop.eup %1336 }
 0x231   :  { %v1339_v57 = vpop.eup %1338 }
 0x232   :  { %v1341_v58 = vpop.eup %1340  ;;  %v984_v59 = vadd.f32 %v1339_v57, %v1337_v55 }
 0x233   :  { %1006 = vmatpush.msrb.mxu2 %v1341_v58  ;;  %v1343_v42 = vpop.eup %1342 }
 0x234   :  { %v985_v60 = vadd.f32 %v1341_v58, %v984_v59 }
 0x235   :  { %1007 = vmatpush.msrb.mxu2 %v1341_v58  ;;  %v858_v24 = vpop.f32.mrf.mxu0 }
 0x236   :  { %v986_v62 = vadd.f32 %v1341_v58, %v985_v60 }
 0x237   :  { %1008 = vmatpush.msrb.mxu2 %v1341_v58 }
 0x238   :  { %v987_v63 = vadd.f32 %v1341_v58, %v986_v62 }
 0x239   :  { %1009 = vmatpush.msrb.mxu2 %v1341_v58 }
 0x23a   :  { %v988_v1 = vadd.f32 %v1341_v58, %v987_v63 }
 0x23b   :  { %1010 = vmatpush.msrb.mxu2 %v1341_v58 }
 0x23c   :  { %v989_v2 = vadd.f32 %v1341_v58, %v988_v1 }
 0x23d   :  { %1011 = vmatpush.msrb.mxu2 %v1341_v58  ;;  %v860_v26 = vpop.f32.mrf.mxu0 }
 0x23e   :  { %v990_v4 = vadd.f32 %v1341_v58, %v989_v2 }
 0x23f   :  { %1012 = vmatpush.msrb.mxu2 %v1341_v58 }
 0x240   :  { %v991_v5 = vadd.f32 %v1341_v58, %v990_v4 }
 0x241   :  { %1013 = vmatpush.msrb.mxu2 %v1341_v58 }
 0x242   :  { %v992_v11 = vadd.f32 %v1341_v58, %v991_v5 }
 0x243   :  { %1014 = vmatpush.msrb.mxu2 %v1341_v58 }
 0x244   :  { %v993_v13 = vadd.f32 %v1341_v58, %v992_v11 }
 0x245   :  { %1015 = vmatpush.msrb.mxu2 %v1341_v58  ;;  %v863_v28 = vpop.f32.mrf.mxu0 }
 0x246   :  { %v994_v15 = vadd.f32 %v1341_v58, %v993_v13 }
 0x247   :  { %1016 = vmatpush.msrb.mxu2 %v1341_v58 }
 0x248   :  { %v995_v16 = vadd.f32 %v1341_v58, %v994_v15 }
 0x249   :  { %1017 = vmatpush.msrb.mxu2 %v1341_v58 }
 0x24a   :  { %v996_v21 = vadd.f32 %v1341_v58, %v995_v16 }
 0x24b   :  { %1018 = vmatpush.msrb.mxu2 %v1341_v58 }
 0x24c   :  { %v997_v23 = vadd.f32 %v1341_v58, %v996_v21 }
 0x24d   :  { %1019 = vmatpush.msrb.mxu2 %v1341_v58  ;;  %v865_v29 = vpop.f32.mrf.mxu0 }
 0x24e   :  { %v998_v22 = vadd.f32 %v1341_v58, %v997_v23 }
 0x24f   :  { %1020 = vmatpush.msrb.mxu2 %v1339_v57 }
 0x250   :  { %v999_v34 = vrot.slane %v998_v22, 4 }
 0x251   :  { %1021 = vmatpush.msrb.mxu2 %v1337_v55 }
 0x252   :  { %1022 = vmatmul.f32.vlgmr.msrb.gmra.mxu2 %v1005_v25  ;;  %v1000_v35 = vadd.f32 %v999_v34, %v998_v22 }
 0x254   :  { %v1001_v37 = vrot.slane %v1000_v35, 2 }
 0x255   :  { %v868_v30 = vpop.f32.mrf.mxu0 }
 0x256   :  { %v1002_v38 = vadd.f32 %v1001_v37, %v1000_v35 }
 0x258   :  { %v1003_v10 = vrot.slane %v1002_v38, 1 }
 0x25a   :  { %v1004_v40 = vadd.f32 %v1003_v10, %v1002_v38 }
 0x25c   :  { %1344 = vrcp.f32 %v1004_v40 }
 0x25d   :  { %v870_v31 = vpop.f32.mrf.mxu0 }
 0x262   :  { %v1345_v8 = vpop.eup %1344 }
 0x265   :  { %v873_v32 = vpop.f32.mrf.mxu0 }
 0x268   :  { %v748_v41 = vpop.f32.mrf.mxu2 }
 0x269   :  { %v752_v45 = vmul.f32 %v1343_v42, %v748_v41 }
 0x26d   :  { %v875_v19 = vpop.f32.mrf.mxu0 }
 0x275   :  { %v878_v17 = vpop.f32.mrf.mxu0 }
 0x27d   :  { %v880_v9 = vpop.f32.mrf.mxu0 }
 0x2d5   :  { %v1023_v44 = vpop.f32.mrf.mxu2 }
 0x2d6   :  { %v1027_v46 = vmul.f32 %v1345_v8, %v1023_v44 }
 0x2d8   :  { %v1028_v47 = vadd.f32 %v1027_v46, %v752_v45 }
 0x2da   :  { %v1036_v48 = vadd.f32 %v1035_v27, %v1028_v47 }
 0x2dc   :  { %1037 = vst [vmem:[#allocation6] sm:$0x1] %v1036_v48 }
 0x2dd   :  { %1048 = dma.vmem_to_hbm [thread:$0]  %s1044_s8, 16, %s1046_s11, [#allocation7]  }
 0x2de   :  { %1370 = dma.done.wait [#allocation7], 16  }
 0x2df   :  { %1371 = vsyncadd [#allocation7], 4294967280 }
 0x2e0   :  { %1053 = vsyncpa [#allocation7], 1 }

</bundles_post_ra>
